<compile_context>
chip_gen: v5e
topology: v5e:2x2
jax: 0.10.0
libtpu: 0.0.40
codegen_flags: <defaults>
</compile_context>

<pallas_src>
import numpy as np
import jax
import jax.numpy as jnp
from jax.experimental import pallas as pl
from jax.experimental.pallas import tpu as pltpu

# Matmul operands are cast to this dtype wrapper-side (halves HBM->VMEM bytes
# and uses the native bf16 MXU path on v5e/v6e/v7x); accumulation stays f32.
_MATMUL_DTYPE = jnp.bfloat16

# Safe on all generations (physical VMEM: 128 MiB v5e/v6e, 64 MiB v7x); raise
# toward physical when enlarging tiles at detection-scale shapes.
_VMEM_LIMIT_BYTES = 32 * 1024 * 1024


def _round_up(x, m):
    return (x + m - 1) // m * m


# --------------------------- Pallas kernels ---------------------------------

def _linear_kernel(x_ref, w_ref, b_ref, o_ref):
    o_ref[...] = (jnp.dot(x_ref[...], w_ref[...],
                          preferred_element_type=jnp.float32)
                  + b_ref[...]).astype(o_ref.dtype)


def _masked_linear_kernel(x_ref, w_ref, b_ref, m_ref, o_ref):
    # m_ref holds 1.0 for padded rows; zeroing is fused into the matmul tile
    # (saves a full HBM read+write of the value tensor vs. a separate where).
    y = (jnp.dot(x_ref[...], w_ref[...], preferred_element_type=jnp.float32)
         + b_ref[...])
    o_ref[...] = (y * (1.0 - m_ref[...])).astype(o_ref.dtype)


def pallas_linear(x, w, b, row_mask=None, tile_rows=1024):
    """y = x @ w + b (f32 accumulate / f32 out); operands are cast to bf16
    here (wrapper-side, so the kernel DMAs half the bytes).  Optionally zeroes
    rows where row_mask == 1.  x:(R,Cin)  w:(Cin,Cout)  b:(Cout,)."""
    R, Cin = x.shape
    Cout = w.shape[1]
    tr = min(tile_rows, _round_up(R, 8))
    # Only split a single-step grid when both halves keep >= 512 rows (gives
    # both v7x TensorCores work without doubling per-step overhead on
    # single-TC v5e/v6e for tiny matmuls).
    if R >= 1024 and _round_up(R, tr) == tr:
        tr = _round_up((R + 1) // 2, 8)
    Rp = _round_up(R, tr)
    xp = x.astype(_MATMUL_DTYPE)
    if Rp != R:
        xp = jnp.pad(xp, ((0, Rp - R), (0, 0)))
    wp = w.astype(_MATMUL_DTYPE)

    args = [xp, wp, b.astype(jnp.float32).reshape(1, Cout)]
    in_specs = [pl.BlockSpec((tr, Cin), lambda i: (i, 0)),
                pl.BlockSpec((Cin, Cout), lambda i: (0, 0)),
                pl.BlockSpec((1, Cout), lambda i: (0, 0))]
    kernel = _linear_kernel
    if row_mask is not None:
        m = row_mask.astype(jnp.float32).reshape(R, 1)
        if Rp != R:
            m = jnp.pad(m, ((0, Rp - R), (0, 0)))
        args.append(m)
        in_specs.append(pl.BlockSpec((tr, 1), lambda i: (i, 0)))
        kernel = _masked_linear_kernel

    out = pl.pallas_call(
        kernel,
        out_shape=jax.ShapeDtypeStruct((Rp, Cout), jnp.float32),
        grid=(Rp // tr,),
        in_specs=in_specs,
        out_specs=pl.BlockSpec((tr, Cout), lambda i: (i, 0)),
        compiler_params=pltpu.CompilerParams(
            dimension_semantics=("parallel",),
            vmem_limit_bytes=_VMEM_LIMIT_BYTES),
    )(*args)
    return out[:R] if Rp != R else out


def pallas_deform_combine_proj(samples, w_out, b_out, tile_rows=256):
    """samples:(N, Lq, LP, d_model)  ->  output_proj(sum over LP) : (N, Lq, dout).

    Fuses the reduction over the LP = n_levels*n_points attention-weighted
    samples with the output projection in one Pallas kernel.  The row-tile
    grid axis is 'parallel' (megacore) and each VMEM block is small, so this
    scales to detection shapes.  The store is lane-dense (tr, d_model): no
    per-head partial stores and no in-kernel concatenate."""
    N, Lq, LP, dm = samples.shape
    dout = w_out.shape[1]
    R = N * Lq
    x = samples.reshape(R, LP, dm).astype(_MATMUL_DTYPE)
    tr = min(tile_rows, _round_up(R, 8))
    Rp = _round_up(R, tr)
    if Rp != R:
        x = jnp.pad(x, ((0, Rp - R), (0, 0), (0, 0)))

    def kernel(s_ref, w_ref, b_ref, o_ref):
        # Static unroll over the (small) LP axis: each read is a plain 2-D
        # load from the 3-D block, summed in f32.
        acc = s_ref[:, 0, :].astype(jnp.float32)
        for k in range(1, LP):
            acc = acc + s_ref[:, k, :].astype(jnp.float32)
        y = (jnp.dot(acc.astype(w_ref.dtype), w_ref[...],
                     preferred_element_type=jnp.float32) + b_ref[...])
        o_ref[...] = y.astype(o_ref.dtype)

    out = pl.pallas_call(
        kernel,
        out_shape=jax.ShapeDtypeStruct((Rp, dout), jnp.float32),
        grid=(Rp // tr,),
        in_specs=[pl.BlockSpec((tr, LP, dm), lambda i: (i, 0, 0)),
                  pl.BlockSpec((dm, dout), lambda i: (0, 0)),
                  pl.BlockSpec((1, dout), lambda i: (0, 0))],
        out_specs=pl.BlockSpec((tr, dout), lambda i: (i, 0)),
        compiler_params=pltpu.CompilerParams(
            dimension_semantics=("parallel",),
            vmem_limit_bytes=_VMEM_LIMIT_BYTES),
    )(x, w_out.astype(_MATMUL_DTYPE), b_out.astype(jnp.float32).reshape(1, dout))
    out = out[:R] if Rp != R else out
    return out.reshape(N, Lq, dout)


# ------------------------------ JAX glue -------------------------------------

def box_cxcywh_to_xyxy(x):
    xc, yc, w, h = jnp.split(x, 4, axis=-1)
    return jnp.concatenate(
        [xc - 0.5 * w, yc - 0.5 * h, xc + 0.5 * w, yc + 0.5 * h], axis=-1)


def roi_align_gap(feat_flat, rois_xyxy, H, W, out_size=7, sampling_ratio=2):
    """roi_align(output_size=7, spatial_scale=1.0, aligned=True) followed by a
    global average pool, channels-last.  The GAP over bins equals the mean
    over the full (7*s x 7*s) sample grid; the four bilinear corners of each
    sample are fetched with ONE gather of a 2x2 window (clamping x0<=W-2 and
    y0<=H-2 preserves exact bilinear values).
    feat_flat:(N, H*W, C)  rois_xyxy:(N, Lq, 4)  ->  (N, Lq, C)."""
    # TODO(synk): torchvision default sampling_ratio=-1 is adaptive per-ROI; a
    # fixed 2x2 grid per bin is used here.  At detection scale, move this
    # bilinear sample + GAP into a Pallas kernel with a manual DMA row gather.
    s = sampling_ratio
    G = out_size * s
    x1 = rois_xyxy[..., 0] - 0.5
    y1 = rois_xyxy[..., 1] - 0.5
    x2 = rois_xyxy[..., 2] - 0.5
    y2 = rois_xyxy[..., 3] - 0.5
    bin_w = (x2 - x1) / out_size
    bin_h = (y2 - y1) / out_size
    grid = (jnp.arange(G, dtype=jnp.float32) + 0.5) / s            # bin units
    ys = y1[..., None] + grid[None, None, :] * bin_h[..., None]    # (N, Lq, G)
    xs = x1[..., None] + grid[None, None, :] * bin_w[..., None]
    valid_y = (ys > -1.0) & (ys < H)
    valid_x = (xs > -1.0) & (xs < W)
    yc = jnp.clip(ys, 0.0, H - 1)
    xc = jnp.clip(xs, 0.0, W - 1)
    y0 = jnp.minimum(jnp.floor(yc), H - 2).astype(jnp.int32)   # window-safe
    x0 = jnp.minimum(jnp.floor(xc), W - 2).astype(jnp.int32)
    ly = (yc - y0)[..., :, None]                               # (N, Lq, G, 1)
    lx = (xc - x0)[..., None, :]                               # (N, Lq, 1, G)
    base = y0[..., :, None] * W + x0[..., None, :]             # (N, Lq, G, G)
    idx = jnp.stack([base, base + 1, base + W, base + W + 1], axis=-1)
    vals = jax.vmap(lambda f, ix: f[ix])(feat_flat, idx)       # (N,Lq,G,G,4,C)
    wts = jnp.stack([(1 - ly) * (1 - lx), (1 - ly) * lx,
                     ly * (1 - lx), ly * lx], axis=-1)         # (N,Lq,G,G,4)
    val = jnp.sum(vals * wts[..., None], axis=-2)              # (N,Lq,G,G,C)
    valid = (valid_y[..., :, None] & valid_x[..., None, :])[..., None]
    val = jnp.where(valid, val, 0.0)
    return val.mean(axis=(2, 3))                               # (N, Lq, C)


def build_sampling_indices(points, attn, spatial_shapes, level_start_index):
    """Bilinear corner indices into the flattened all-level spatial axis and
    folded (bilinear * attention) weights.  No scatter and no dense matrix.
    points:(N,Lq,nH,L,P,2)  attn:(N,Lq,nH,L,P)
      ->  idx:(N,Lq,nH,L,P,4) int32,  wgt:(N,Lq,nH,L,P,4) float32."""
    N, Lq, nH, L, P, _ = points.shape
    idx_lvls, wgt_lvls = [], []
    for l in range(L):
        H, W = int(spatial_shapes[l, 0]), int(spatial_shapes[l, 1])
        start = int(level_start_index[l])
        loc = points[:, :, :, l]                      # (N, Lq, nH, P, 2)
        a = attn[:, :, :, l]                          # (N, Lq, nH, P)
        x = loc[..., 0] * W - 0.5                     # align_corners=False
        y = loc[..., 1] * H - 0.5
        x0f = jnp.floor(x)
        y0f = jnp.floor(y)
        lx = x - x0f
        ly = y - y0f
        x0 = x0f.astype(jnp.int32)
        y0 = y0f.astype(jnp.int32)
        c_idx, c_wgt = [], []
        for dy, dx, cw in ((0, 0, (1 - ly) * (1 - lx)), (0, 1, (1 - ly) * lx),
                           (1, 0, ly * (1 - lx)), (1, 1, ly * lx)):
            cx = x0 + dx
            cy = y0 + dy
            valid = (cx >= 0) & (cx < W) & (cy >= 0) & (cy < H)
            flat = start + jnp.clip(cy, 0, H - 1) * W + jnp.clip(cx, 0, W - 1)
            c_idx.append(flat)
            c_wgt.append(jnp.where(valid, cw, 0.0) * a)   # zero-padding border
        idx_lvls.append(jnp.stack(c_idx, axis=-1))        # (N, Lq, nH, P, 4)
        wgt_lvls.append(jnp.stack(c_wgt, axis=-1))
    idx = jnp.stack(idx_lvls, axis=3)                     # (N, Lq, nH, L, P, 4)
    wgt = jnp.stack(wgt_lvls, axis=3).astype(jnp.float32)
    return idx, wgt


def deform_sample_values(value, idx, wgt, n_heads, d_head):
    """Gather the bilinear corner rows of `value` per head and reduce the four
    corners -> per-point attention-weighted samples, head-concatenated
    (lane-dense) along the channel axis:  (N, Lq, L*P, n_heads*d_head)."""
    # TODO(synk): at detection scale move this row gather inside the Pallas
    # kernel (scalar-prefetched indices + manual DMA) instead of XLA gather.
    N, S, _ = value.shape
    _, Lq, nH, L, P, _ = idx.shape
    LP = L * P
    v_h = value.reshape(N, S, nH, d_head).transpose(0, 2, 1, 3)    # (N,nH,S,Dh)
    v_h = v_h.reshape(N * nH, S, d_head)
    idx_h = idx.transpose(0, 2, 1, 3, 4, 5).reshape(N * nH, Lq, LP * 4)
    wgt_h = wgt.transpose(0, 2, 1, 3, 4, 5).reshape(N * nH, Lq, LP, 4)
    g = jax.vmap(lambda v, i: v[i])(v_h, idx_h)                # (N*nH,Lq,LP*4,Dh)
    g = g.reshape(N * nH, Lq, LP, 4, d_head)
    samp = jnp.sum(g * wgt_h[..., None], axis=3)               # (N*nH,Lq,LP,Dh)
    samp = samp.reshape(N, nH, Lq, LP, d_head).transpose(0, 2, 3, 1, 4)
    return samp.reshape(N, Lq, LP, nH * d_head)


def xavier_uniform(key, shape):
    bound = float(np.sqrt(6.0 / (shape[0] + shape[1])))
    return jax.random.uniform(key, shape, jnp.float32, -bound, bound)


def init_params(key, d_model, n_levels, n_heads, n_points):
    k1, k2, k3 = jax.random.split(key, 3)
    per_lvl = n_heads * n_points * 3     # 2 coords + 1 weight per (head, point)
    return {
        "value_proj_w": xavier_uniform(k1, (d_model, d_model)),
        "value_proj_b": jnp.zeros((d_model,), jnp.float32),
        "output_proj_w": xavier_uniform(k2, (d_model, d_model)),
        "output_proj_b": jnp.zeros((d_model,), jnp.float32),
        # TODO(synk): key_points_sampling_module is None in the reference
        # __init__ (injected externally); synthesized here as per-level
        # roi-GAP -> linear heads producing (points, weights).
        "kps_w": 0.1 * jax.random.normal(k3, (d_model, n_levels * per_lvl),
                                         jnp.float32),
        "kps_b": jnp.zeros((n_levels * per_lvl,), jnp.float32),
    }


def msmd_deform_region_attn_forward(params, query, reference_points,
                                    input_flatten, spatial_shapes,
                                    level_start_index, input_padding_mask,
                                    d_model, n_levels, n_heads, n_points):
    """Default (non-fusion, single-branch) forward path of MSMDDeformRegionAttn.
    spatial_shapes / level_start_index are *static* numpy int arrays."""
    N, Len_q, _ = query.shape
    _, Len_in, _ = input_flatten.shape
    assert int(np.sum(spatial_shapes[:, 0] * spatial_shapes[:, 1])) == Len_in
    d_head = d_model // n_heads

    # ---- value projection (Pallas matmul; padding-mask zeroing fused) ----
    row_mask = (input_padding_mask.reshape(N * Len_in)
                if input_padding_mask is not None else None)
    value = pallas_linear(input_flatten.reshape(N * Len_in, d_model),
                          params["value_proj_w"], params["value_proj_b"],
                          row_mask=row_mask).reshape(N, Len_in, d_model)

    # ---- level-0 map (channels-last) + roi_align(7x7, aligned) + GAP ----
    H0, W0 = int(spatial_shapes[0, 0]), int(spatial_shapes[0, 1])
    feat0 = value[:, :H0 * W0]                       # (N, H0*W0, C)
    ref_xywh = reference_points[:, :, 0, :]
    ref_xyxy = box_cxcywh_to_xyxy(ref_xywh) * jnp.asarray(
        [W0, H0, W0, H0], jnp.float32)
    pooled = roi_align_gap(feat0, ref_xyxy, H0, W0)  # (N, Lq, C)

    # ---- synthetic per-level key-point sampling heads (Pallas matmul) ----
    K = n_levels * n_heads * n_points * 3
    Kp = _round_up(K, 128)             # lane-dense output store (192 -> 256)
    kps_w = jnp.pad(params["kps_w"], ((0, 0), (0, Kp - K)))
    kps_b = jnp.pad(params["kps_b"], (0, Kp - K))
    head_out = pallas_linear(pooled.reshape(N * Len_q, d_model),
                             kps_w, kps_b)[:, :K]
    head_out = head_out.reshape(N, Len_q, n_levels, n_heads * n_points * 3)
    pts_rel = jnp.tanh(head_out[..., :n_heads * n_points * 2]).reshape(
        N, Len_q, n_levels, n_heads, n_points, 2)
    wts = head_out[..., n_heads * n_points * 2:].reshape(
        N, Len_q, n_levels, n_heads, n_points)
    points_relative_box_all = jnp.transpose(pts_rel, (0, 1, 3, 2, 4, 5))
    weights_all = jnp.transpose(wts, (0, 1, 3, 2, 4))         # (N,Lq,nH,L,P)

    points = (reference_points[:, :, None, :, None, :2]
              + points_relative_box_all
              * reference_points[:, :, None, :, None, 2:] * 0.5)

    tmp_weight_all = weights_all.reshape(N, Len_q, n_heads, -1)
    attn = jax.nn.softmax(tmp_weight_all, axis=-1).reshape(
        N, Len_q, n_heads, n_levels, n_points)

    # ---- multi-scale deformable attention: gather-based sampling feeding a
    #      fused (reduce-over-points + output projection) Pallas kernel ----
    idx, wgt = build_sampling_indices(points, attn, spatial_shapes,
                                      level_start_index)
    samples = deform_sample_values(value, idx, wgt, n_heads, d_head)
    output = pallas_deform_combine_proj(samples, params["output_proj_w"],
                                        params["output_proj_b"])
    return output, points, attn, None, None


# --------------------------------- main ---------------------------------------

if __name__ == "__main__":
    d_model, n_levels, n_heads, n_points = 32, 4, 4, 4
    N, Len_q = 2, 8
    spatial_shapes = np.array([[8, 8], [8, 8], [4, 4], [4, 4]], dtype=np.int32)
    hw = spatial_shapes[:, 0] * spatial_shapes[:, 1]
    level_start_index = np.concatenate([[0], np.cumsum(hw)[:-1]]).astype(np.int32)
    Len_in = int(hw.sum())

    key = jax.random.PRNGKey(0)
    kp, kq, kr, kf = jax.random.split(key, 4)
    params = init_params(kp, d_model, n_levels, n_heads, n_points)

    query = jax.random.normal(kq, (N, Len_q, d_model), jnp.float32)
    ref_cxy = jax.random.uniform(kr, (N, Len_q, n_levels, 2),
                                 minval=0.25, maxval=0.75)
    ref_wh = jnp.full((N, Len_q, n_levels, 2), 0.3, jnp.float32)
    reference_points = jnp.concatenate([ref_cxy, ref_wh], axis=-1)
    input_flatten = jax.random.normal(kf, (N, Len_in, d_model), jnp.float32)
    input_padding_mask = jnp.zeros((N, Len_in), dtype=bool)

    output, points, attn, out_rgb, out_t = msmd_deform_region_attn_forward(
        params, query, reference_points, input_flatten,
        spatial_shapes, level_start_index, input_padding_mask,
        d_model, n_levels, n_heads, n_points)
    jax.block_until_ready(output)

    assert output.shape == (N, Len_q, d_model)
    assert points.shape == (N, Len_q, n_heads, n_levels, n_points, 2)
    assert attn.shape == (N, Len_q, n_heads, n_levels, n_points)
    assert out_rgb is None and out_t is None
    print("KERNEL_OK")
</pallas_src>

<mosaic_0001>
module attributes {stable_mosaic.version = 11 : i64} {
  func.func @_masked_linear_kernel(%arg0: i32, %arg1: memref<320x32xbf16, #tpu.memory_space<vmem>>, %arg2: memref<32x32xbf16, #tpu.memory_space<vmem>>, %arg3: memref<1x32xf32, #tpu.memory_space<vmem>>, %arg4: memref<320x1xf32, #tpu.memory_space<vmem>>, %arg5: memref<320x32xf32, #tpu.memory_space<vmem>>) attributes {dimension_semantics = [#tpu.dimension_semantics<parallel>], iteration_bounds = array<i64: 1>, scalar_prefetch = 0 : i64, scratch_operands = 0 : i64, tpu.core_type = #tpu.core_type<tc>, window_params = [{transform_indices = @transform_0, window_bounds = array<i64: 320, 32>}, {pipeline_mode = #tpu.pipeline_mode<synchronous>, transform_indices = @transform_1, window_bounds = array<i64: 32, 32>}, {pipeline_mode = #tpu.pipeline_mode<synchronous>, transform_indices = @transform_2, window_bounds = array<i64: 1, 32>}, {transform_indices = @transform_3, window_bounds = array<i64: 320, 1>}, {transform_indices = @transform_4, window_bounds = array<i64: 320, 32>}]} {
    %c0 = arith.constant 0 : index
    %c0_0 = arith.constant 0 : index
    %0 = vector.load %arg1[%c0, %c0_0] : memref<320x32xbf16, #tpu.memory_space<vmem>>, vector<320x32xbf16>
    %c0_1 = arith.constant 0 : index
    %c0_2 = arith.constant 0 : index
    %1 = vector.load %arg2[%c0_1, %c0_2] : memref<32x32xbf16, #tpu.memory_space<vmem>>, vector<32x32xbf16>
    %cst = arith.constant dense<0.000000e+00> : vector<320x32xf32>
    %2 = tpu.matmul %0, %1, %cst {dimension_numbers = #tpu.dot_dimension_numbers<[1], [0], [0], [1], [0, 0, 1, 1], [], []>} : vector<320x32xbf16>, vector<32x32xbf16>, vector<320x32xf32> -> vector<320x32xf32>
    %c0_3 = arith.constant 0 : index
    %c0_4 = arith.constant 0 : index
    %3 = vector.load %arg3[%c0_3, %c0_4] : memref<1x32xf32, #tpu.memory_space<vmem>>, vector<1x32xf32>
    %4 = vector.broadcast %3 : vector<1x32xf32> to vector<320x32xf32>
    %5 = arith.addf %2, %4 : vector<320x32xf32>
    %c0_5 = arith.constant 0 : index
    %c0_6 = arith.constant 0 : index
    %6 = vector.load %arg4[%c0_5, %c0_6] : memref<320x1xf32, #tpu.memory_space<vmem>>, vector<320x1xf32>
    %cst_7 = arith.constant 1.000000e+00 : f32
    %7 = vector.broadcast %cst_7 : f32 to vector<320x1xf32>
    %8 = arith.subf %7, %6 : vector<320x1xf32>
    %9 = vector.broadcast %8 : vector<320x1xf32> to vector<320x32xf32>
    %10 = arith.mulf %5, %9 : vector<320x32xf32>
    %c0_8 = arith.constant 0 : index
    %c0_9 = arith.constant 0 : index
    %11 = vector.load %arg5[%c0_8, %c0_9] : memref<320x32xf32, #tpu.memory_space<vmem>>, vector<320x32xf32>
    tpu.vector_store %arg5[%c0_8, %c0_9], %10 {strides = array<i32>} : memref<320x32xf32, #tpu.memory_space<vmem>>, vector<320x32xf32>,
    return
  }
  func.func @transform_0(%arg0: i32) -> (i32, i32) {
    %c0_i32 = arith.constant 0 : i32
    %c0_i32_0 = arith.constant 0 : i32
    return %arg0, %c0_i32 : i32, i32
  }
  func.func @transform_1(%arg0: i32) -> (i32, i32) {
    %c0_i32 = arith.constant 0 : i32
    %c0_i32_0 = arith.constant 0 : i32
    %c0_i32_1 = arith.constant 0 : i32
    return %c0_i32, %c0_i32_0 : i32, i32
  }
  func.func @transform_2(%arg0: i32) -> (i32, i32) {
    %c0_i32 = arith.constant 0 : i32
    %c0_i32_0 = arith.constant 0 : i32
    %c0_i32_1 = arith.constant 0 : i32
    return %c0_i32, %c0_i32_0 : i32, i32
  }
  func.func @transform_3(%arg0: i32) -> (i32, i32) {
    %c0_i32 = arith.constant 0 : i32
    %c0_i32_0 = arith.constant 0 : i32
    return %arg0, %c0_i32 : i32, i32
  }
  func.func @transform_4(%arg0: i32) -> (i32, i32) {
    %c0_i32 = arith.constant 0 : i32
    %c0_i32_0 = arith.constant 0 : i32
    return %arg0, %c0_i32 : i32, i32
  }
}

</mosaic_0001>

<bundles_post_ra>
// kernel: tpu_custom_call.1
= control target key start
LH: loop header
LB: loop body
LE: loop exit
PB: predicated region body
PF: predicated region fallthrough
CT: control target
= control target key end

     0   :  { %v853_v0 = vmov 0   ;;  %vm178_vm0 = vcmask 261120   ;;  %s1341_s3 = inlined_call_operand.vmem [shape: f32[320,1], index: 3, kind: input, shape index: {}]   ;;  %s1342_s1 = inlined_call_operand.vmem [shape: bf16[32,32], index: 1, kind: input, shape index: {}]   ;;  %s1343_s0 = inlined_call_operand.vmem [shape: bf16[320,32], index: 0, kind: input, shape index: {}]   ;;  %s1344_s2 = inlined_call_operand.vmem [shape: f32[1,32], index: 2, kind: input, shape index: {}]   ;;  %s1345_s4 = inlined_call_operand.vmem [shape: f32[320,32], index: 4, kind: output, shape index: {}]  }
   0x1   :  { %851 = vset.pattern.permute.xlu2 %v853_v0  ;;  %850 = vset.pattern.permute.xlu1 %v853_v0  ;;  %v352_v1 = vld [vmem:[%s1341_s3 + $0x20] sm:$0xff]  ;;  %v350_v2 = vld [vmem:[%s1341_s3 + $0x10] sm:$0xff]  ;;  %v841_v7 = vld [vmem:[%s1342_s1 + $0x8] sm:$0xff] }
   0x2   :  { %v348_v3 = vld [vmem:[%s1341_s3] sm:$0xff]  ;;  %849 = vset.pattern.permute.xlu0 %v853_v0  ;;  %v392_v4 = vsub.f32 1.0, %v352_v1  ;;  %v390_v5 = vsub.f32 1.0, %v350_v2  ;;  %245 = vmatpush.bf16.msra.mxu0 %v841_v7  ;;  %v353_v9 = vld [vmem:[%s1341_s3 + $0x28] sm:$0xff]  ;;  %v351_v10 = vld [vmem:[%s1341_s3 + $0x18] sm:$0xff] }
   0x3   :  { %v388_v6 = vsub.f32 1.0, %v348_v3  ;;  %v840_v8 = vld [vmem:[%s1342_s1] sm:$0xff]  ;;  %842 = vmatpush.bf16.msra.mxu1 %v841_v7  ;;  %843 = vmatpush.bf16.msra.mxu2 %v841_v7  ;;  %v393_v12 = vsub.f32 1.0, %v353_v9  ;;  %v349_v13 = vld [vmem:[%s1341_s3 + $0x8] sm:$0xff]  ;;  %v830_v15 = vld [vmem:[%s1343_s0 + $0x50] sm:$0xff]  ;;  %v391_v17 = vsub.f32 1.0, %v351_v10 }
   0x4   :  { %450 = vperm.xlu2 %851, %v392_v4   ;;  %440 = vperm.xlu1 %850, %v390_v5   ;;  %v820_v11 = vld [vmem:[%s1343_s0] sm:$0xff]  ;;  %v825_v14 = vld [vmem:[%s1343_s0 + $0x28] sm:$0xff]  ;;  %v835_v16 = vld [vmem:[%s1343_s0 + $0x78] sm:$0xff]  ;;  %v389_v18 = vsub.f32 1.0, %v349_v13 }
   0x5   :  { %430 = vperm.xlu0 %849, %v388_v6   ;;  %844 = vmatpush.bf16.msra.mxu3 %v841_v7  ;;  %v356_v19 = vld [vmem:[%s1341_s3 + $0x40] sm:$0xff]  ;;  %v355_v20 = vld [vmem:[%s1341_s3 + $0x38] sm:$0xff]  ;;  %v354_v22 = vld [vmem:[%s1341_s3 + $0x30] sm:$0xff] }
   0x6   :  { %246 = vmatpush.bf16.msra.mxu0 %v840_v8  ;;  %v396_v21 = vsub.f32 1.0, %v356_v19  ;;  %v395_v23 = vsub.f32 1.0, %v355_v20  ;;  %v394_v24 = vsub.f32 1.0, %v354_v22  ;;  %v359_v25 = vld [vmem:[%s1341_s3 + $0x58] sm:$0xff]  ;;  %v358_v26 = vld [vmem:[%s1341_s3 + $0x50] sm:$0xff]  ;;  %v821_v27 = vld [vmem:[%s1343_s0 + $0x8] sm:$0xff] }
   0x7   :  { %845 = vmatpush.bf16.msra.mxu1 %v840_v8  ;;  %846 = vmatpush.bf16.msra.mxu2 %v840_v8  ;;  %v399_v28 = vsub.f32 1.0, %v359_v25  ;;  %v357_v29 = vld [vmem:[%s1341_s3 + $0x48] sm:$0xff]  ;;  %v826_v30 = vld [vmem:[%s1343_s0 + $0x30] sm:$0xff]  ;;  %v831_v31 = vld [vmem:[%s1343_s0 + $0x58] sm:$0xff]  ;;  %v398_v33 = vsub.f32 1.0, %v358_v26 }
   0x8   :  { %v836_v32 = vld [vmem:[%s1343_s0 + $0x80] sm:$0xff]  ;;  %v397_v34 = vsub.f32 1.0, %v357_v29  ;;  %v362_v35 = vld [vmem:[%s1341_s3 + $0x70] sm:$0xff]  ;;  %v361_v36 = vld [vmem:[%s1341_s3 + $0x68] sm:$0xff] }
   0x9   :  { %847 = vmatpush.bf16.msra.mxu3 %v840_v8  ;;  %800 = vmatmul.msk.bf16.vlgmr.msra.gmra.mxu0 %vm178_vm0, %v820_v11  ;;  %v402_v37 = vsub.f32 1.0, %v362_v35  ;;  %v360_v38 = vld [vmem:[%s1341_s3 + $0x60] sm:$0xff]  ;;  %v401_v39 = vsub.f32 1.0, %v361_v36  ;;  %v365_v41 = vld [vmem:[%s1341_s3 + $0x88] sm:$0xff]  ;;  %v822_v43 = vld [vmem:[%s1343_s0 + $0x10] sm:$0xff] }
   0xa   :  { %805 = vmatmul.msk.bf16.vlgmr.msra.gmra.mxu1 %vm178_vm0, %v825_v14  ;;  %810 = vmatmul.msk.bf16.vlgmr.msra.gmra.mxu2 %vm178_vm0, %v830_v15  ;;  %v400_v40 = vsub.f32 1.0, %v360_v38  ;;  %v364_v42 = vld [vmem:[%s1341_s3 + $0x80] sm:$0xff]  ;;  %v405_v44 = vsub.f32 1.0, %v365_v41  ;;  %v363_v45 = vld [vmem:[%s1341_s3 + $0x78] sm:$0xff]  ;;  %v837_v48 = vld [vmem:[%s1343_s0 + $0x88] sm:$0xff] }
   0xb   :  { %v827_v46 = vld [vmem:[%s1343_s0 + $0x38] sm:$0xff]  ;;  %v832_v47 = vld [vmem:[%s1343_s0 + $0x60] sm:$0xff]  ;;  %v404_v49 = vsub.f32 1.0, %v364_v42  ;;  %v403_v50 = vsub.f32 1.0, %v363_v45  ;;  %v366_v54 = vld [vmem:[%s1341_s3 + $0x90] sm:$0xff] }
   0xc   :  { %455 = vperm.xlu2 %851, %v393_v12   ;;  %815 = vmatmul.msk.bf16.vlgmr.msra.gmra.mxu3 %vm178_vm0, %v835_v16  ;;  %v368_v51 = vld [vmem:[%s1341_s3 + $0xa0] sm:$0xff]  ;;  %v367_v52 = vld [vmem:[%s1341_s3 + $0x98] sm:$0xff]  ;;  %v406_v56 = vsub.f32 1.0, %v366_v54  ;;  %v370_v58 = vld [vmem:[%s1341_s3 + $0xb0] sm:$0xff] }
   0xd   :  { %445 = vperm.xlu1 %850, %v391_v17   ;;  %435 = vperm.xlu0 %849, %v389_v18   ;;  %v408_v53 = vsub.f32 1.0, %v368_v51  ;;  %v407_v55 = vsub.f32 1.0, %v367_v52  ;;  %v371_v57 = vld [vmem:[%s1341_s3 + $0xb8] sm:$0xff]  ;;  %v369_v61 = vld [vmem:[%s1341_s3 + $0xa8] sm:$0xff]  ;;  %v828_v62 = vld [vmem:[%s1343_s0 + $0x40] sm:$0xff]  ;;  %v410_v1 = vsub.f32 1.0, %v370_v58 }
   0xe   :  { %v823_v59 = vld [vmem:[%s1343_s0 + $0x18] sm:$0xff]  ;;  %v411_v60 = vsub.f32 1.0, %v371_v57  ;;  %v833_v63 = vld [vmem:[%s1343_s0 + $0x68] sm:$0xff]  ;;  %v838_v0 = vld [vmem:[%s1343_s0 + $0x90] sm:$0xff]  ;;  %v409_v2 = vsub.f32 1.0, %v369_v61 }
   0xf   :  { %v374_v3 = vld [vmem:[%s1341_s3 + $0xd0] sm:$0xff]  ;;  %v373_v4 = vld [vmem:[%s1341_s3 + $0xc8] sm:$0xff]  ;;  %v372_v6 = vld [vmem:[%s1341_s3 + $0xc0] sm:$0xff] }
  0x10   :  { %v414_v5 = vsub.f32 1.0, %v374_v3  ;;  %v413_v7 = vsub.f32 1.0, %v373_v4  ;;  %v412_v8 = vsub.f32 1.0, %v372_v6  ;;  %v377_v9 = vld [vmem:[%s1341_s3 + $0xe8] sm:$0xff]  ;;  %v376_v10 = vld [vmem:[%s1341_s3 + $0xe0] sm:$0xff]  ;;  %v375_v13 = vld [vmem:[%s1341_s3 + $0xd8] sm:$0xff] }
  0x11   :  { %v824_v11 = vld [vmem:[%s1343_s0 + $0x20] sm:$0xff]  ;;  %v417_v12 = vsub.f32 1.0, %v377_v9  ;;  %v829_v14 = vld [vmem:[%s1343_s0 + $0x48] sm:$0xff]  ;;  %v834_v15 = vld [vmem:[%s1343_s0 + $0x70] sm:$0xff]  ;;  %v416_v17 = vsub.f32 1.0, %v376_v10  ;;  %v415_v18 = vsub.f32 1.0, %v375_v13 }
  0x12   :  { %v839_v16 = vld [vmem:[%s1343_s0 + $0x98] sm:$0xff]  ;;  %v380_v19 = vld [vmem:[%s1341_s3 + $0x100] sm:$0xff]  ;;  %v378_v22 = vld [vmem:[%s1341_s3 + $0xf0] sm:$0xff] }
  0x13   :  { %v379_v20 = vld [vmem:[%s1341_s3 + $0xf8] sm:$0xff]  ;;  %v382_v26 = vld [vmem:[%s1341_s3 + $0x110] sm:$0xff]  ;;  %v384_v35 = vld [vmem:[%s1341_s3 + $0x120] sm:$0xff] }
  0x14   :  { %470 = vperm.xlu2 %851, %v396_v21   ;;  %v420_v21 = vsub.f32 1.0, %v380_v19  ;;  %v383_v25 = vld [vmem:[%s1341_s3 + $0x118] sm:$0xff]  ;;  %v422_v29 = vsub.f32 1.0, %v382_v26 }
  0x15   :  { %465 = vperm.xlu1 %850, %v395_v23   ;;  %460 = vperm.xlu0 %849, %v394_v24   ;;  %v419_v23 = vsub.f32 1.0, %v379_v20  ;;  %v418_v24 = vsub.f32 1.0, %v378_v22 }
  0x19   :  { %801 = vmatmul.msk.bf16.gmra.mxu0 %vm178_vm0, %v821_v27  ;;  %v423_v27 = vsub.f32 1.0, %v383_v25 }
  0x1a   :  { %806 = vmatmul.msk.bf16.gmra.mxu1 %vm178_vm0, %v826_v30  ;;  %811 = vmatmul.msk.bf16.gmra.mxu2 %vm178_vm0, %v831_v31  ;;  %v386_v31 = vld [vmem:[%s1341_s3 + $0x130] sm:$0xff] }
  0x1c   :  { %485 = vperm.xlu2 %851, %v399_v28   ;;  %816 = vmatmul.msk.bf16.gmra.mxu3 %vm178_vm0, %v836_v32  ;;  %v381_v28 = vld [vmem:[%s1341_s3 + $0x108] sm:$0xff] }
  0x1d   :  { %480 = vperm.xlu1 %850, %v398_v33   ;;  %475 = vperm.xlu0 %849, %v397_v34   ;;  %v421_v30 = vsub.f32 1.0, %v381_v28  ;;  %v385_v33 = vld [vmem:[%s1341_s3 + $0x128] sm:$0xff]  ;;  %v426_v34 = vsub.f32 1.0, %v386_v31 }
  0x1e   :  { %v425_v36 = vsub.f32 1.0, %v385_v33 }
  0x24   :  { %500 = vperm.xlu2 %851, %v402_v37   ;;  %v424_v37 = vsub.f32 1.0, %v384_v35 }
  0x25   :  { %495 = vperm.xlu1 %850, %v401_v39   ;;  %490 = vperm.xlu0 %849, %v400_v40   ;;  %v387_v39 = vld [vmem:[%s1341_s3 + $0x138] sm:$0xff] }
  0x26   :  { %v427_v40 = vsub.f32 1.0, %v387_v39 }
  0x29   :  { %802 = vmatmul.msk.bf16.gmra.mxu0 %vm178_vm0, %v822_v43 }
  0x2a   :  { %807 = vmatmul.msk.bf16.gmra.mxu1 %vm178_vm0, %v827_v46  ;;  %812 = vmatmul.msk.bf16.gmra.mxu2 %vm178_vm0, %v832_v47 }
  0x2c   :  { %515 = vperm.xlu2 %851, %v405_v44   ;;  %817 = vmatmul.msk.bf16.gmra.mxu3 %vm178_vm0, %v837_v48 }
  0x2d   :  { %510 = vperm.xlu1 %850, %v404_v49   ;;  %505 = vperm.xlu0 %849, %v403_v50   ;;  %v1098_v49 = vld [vmem:[%s1344_s2] ss:$0 sm:$0xff] }
  0x34   :  { %530 = vperm.xlu2 %851, %v408_v53  }
  0x35   :  { %525 = vperm.xlu1 %850, %v407_v55   ;;  %520 = vperm.xlu0 %849, %v406_v56  }
  0x39   :  { %803 = vmatmul.msk.bf16.gmra.mxu0 %vm178_vm0, %v823_v59 }
  0x3a   :  { %808 = vmatmul.msk.bf16.gmra.mxu1 %vm178_vm0, %v828_v62  ;;  %813 = vmatmul.msk.bf16.gmra.mxu2 %vm178_vm0, %v833_v63 }
  0x3c   :  { %545 = vperm.xlu2 %851, %v411_v60   ;;  %818 = vmatmul.msk.bf16.gmra.mxu3 %vm178_vm0, %v838_v0 }
  0x3d   :  { %540 = vperm.xlu1 %850, %v410_v1   ;;  %535 = vperm.xlu0 %849, %v409_v2  }
  0x44   :  { %560 = vperm.xlu2 %851, %v414_v5  }
  0x45   :  { %555 = vperm.xlu1 %850, %v413_v7   ;;  %550 = vperm.xlu0 %849, %v412_v8  }
  0x49   :  { %804 = vmatmul.msk.bf16.gmra.mxu0 %vm178_vm0, %v824_v11 }
  0x4a   :  { %809 = vmatmul.msk.bf16.gmra.mxu1 %vm178_vm0, %v829_v14  ;;  %814 = vmatmul.msk.bf16.gmra.mxu2 %vm178_vm0, %v834_v15 }
  0x4c   :  { %575 = vperm.xlu2 %851, %v417_v12   ;;  %819 = vmatmul.msk.bf16.gmra.mxu3 %vm178_vm0, %v839_v16 }
  0x4d   :  { %570 = vperm.xlu1 %850, %v416_v17   ;;  %565 = vperm.xlu0 %849, %v415_v18  }
  0x54   :  { %590 = vperm.xlu2 %851, %v420_v21  }
  0x55   :  { %585 = vperm.xlu1 %850, %v419_v23   ;;  %580 = vperm.xlu0 %849, %v418_v24  }
  0x5c   :  { %605 = vperm.xlu2 %851, %v423_v27  }
  0x5d   :  { %600 = vperm.xlu1 %850, %v422_v29   ;;  %595 = vperm.xlu0 %849, %v421_v30  }
  0x5e   :  { %v1076_v32 = vpop.permute.xlu2 %450 }
  0x64   :  { %620 = vperm.xlu2 %851, %v426_v34  }
  0x65   :  { %615 = vperm.xlu1 %850, %v425_v36   ;;  %610 = vperm.xlu0 %849, %v424_v37  }
  0x66   :  { %v1084_v38 = vpop.permute.xlu2 %455 }
  0x6d   :  { %625 = vperm.xlu0 %849, %v427_v40  }
  0x6e   :  { %v1089_v41 = vpop.permute.xlu2 %470 }
  0x76   :  { %v486_v42 = vpop.permute.xlu2 %485  ;;  %v441_v43 = vpop.permute.xlu1 %440 }
  0x77   :  { %v431_v44 = vpop.permute.xlu0 %430 }
  0x7e   :  { %v1091_v45 = vpop.permute.xlu2 %500 }
  0x7f   :  { %v446_v46 = vpop.permute.xlu1 %445  ;;  %v436_v47 = vpop.permute.xlu0 %435 }
  0x86   :  { %v1093_v48 = vpop.permute.xlu2 %515  ;;  %v248_v52 = vpop.f32.mrf.mxu0 }
  0x87   :  { %v1100_v50 = vpop.permute.xlu1 %465  ;;  %v1102_v51 = vpop.permute.xlu0 %460  ;;  %v249_v53 = vadd.f32 %v1098_v49, %v248_v52 }
  0x88   :  { %v273_v54 = vpop.f32.mrf.mxu1 }
  0x89   :  { %v628_v55 = vmul.f32 %v431_v44, %v249_v53  ;;  %v274_v56 = vadd.f32 %v1098_v49, %v273_v54 }
  0x8b   :  { %668 = vst.msk [vmem:[%s1345_s4] sm:$0xff] %vm178_vm0, %v628_v55 }
  0x8d   :  { %v298_v59 = vpop.f32.mrf.mxu2 }
  0x8e   :  { %v531_v57 = vpop.permute.xlu2 %530  ;;  %v299_v62 = vadd.f32 %v1098_v49, %v298_v59  ;;  %v250_v0 = vpop.f32.mrf.mxu0 }
  0x8f   :  { %v481_v58 = vpop.permute.xlu1 %480  ;;  %v1110_v61 = vpop.permute.xlu0 %475  ;;  %v251_v3 = vadd.f32 %v1098_v49, %v250_v0 }
  0x90   :  { %v638_v60 = vmul.f32 %v481_v58, %v274_v56  ;;  %v1113_v63 = vpop.f32.mrf.mxu3  ;;  %v275_v1 = vpop.f32.mrf.mxu1  ;;  %v648_v2 = vmul.f32 %v531_v57, %v299_v62 }
  0x91   :  { %v276_v4 = vadd.f32 %v1098_v49, %v275_v1  ;;  %v629_v5 = vmul.f32 %v436_v47, %v251_v3 }
  0x92   :  { %678 = vst.msk [vmem:[%s1345_s4 + $0x50] sm:$0xff] %vm178_vm0, %v638_v60 }
  0x93   :  { %688 = vst.msk [vmem:[%s1345_s4 + $0xa0] sm:$0xff] %vm178_vm0, %v648_v2  ;;  %v639_v6 = vmul.f32 %v486_v42, %v276_v4 }
  0x94   :  { %669 = vst.msk [vmem:[%s1345_s4 + $0x8] sm:$0xff] %vm178_vm0, %v629_v5 }
  0x95   :  { %679 = vst.msk [vmem:[%s1345_s4 + $0x58] sm:$0xff] %vm178_vm0, %v639_v6  ;;  %v300_v9 = vpop.f32.mrf.mxu2 }
  0x96   :  { %v546_v7 = vpop.permute.xlu2 %545  ;;  %v253_v12 = vpop.f32.mrf.mxu0  ;;  %v301_v54 = vadd.f32 %v1098_v49, %v300_v9 }
  0x97   :  { %v496_v8 = vpop.permute.xlu1 %495  ;;  %v491_v10 = vpop.permute.xlu0 %490  ;;  %v254_v14 = vadd.f32 %v1098_v49, %v253_v12 }
  0x98   :  { %v1133_v11 = vpop.f32.mrf.mxu3  ;;  %v278_v13 = vpop.f32.mrf.mxu1 }
  0x99   :  { %v279_v15 = vadd.f32 %v1098_v49, %v278_v13  ;;  %v630_v16 = vmul.f32 %v441_v43, %v254_v14 }
  0x9b   :  { %v640_v17 = vmul.f32 %v491_v10, %v279_v15  ;;  %670 = vst.msk [vmem:[%s1345_s4 + $0x10] sm:$0xff] %vm178_vm0, %v630_v16 }
  0x9d   :  { %680 = vst.msk [vmem:[%s1345_s4 + $0x60] sm:$0xff] %vm178_vm0, %v640_v17  ;;  %v303_v20 = vpop.f32.mrf.mxu2 }
  0x9e   :  { %v1137_v18 = vpop.permute.xlu2 %560  ;;  %v255_v23 = vpop.f32.mrf.mxu0  ;;  %v304_v52 = vadd.f32 %v1098_v49, %v303_v20 }
  0x9f   :  { %v1147_v19 = vpop.permute.xlu1 %510  ;;  %v506_v21 = vpop.permute.xlu0 %505  ;;  %v256_v25 = vadd.f32 %v1098_v49, %v255_v23 }
  0xa0   :  { %v328_v22 = vpop.f32.mrf.mxu3  ;;  %v280_v24 = vpop.f32.mrf.mxu1 }
  0xa1   :  { %v281_v26 = vadd.f32 %v1098_v49, %v280_v24  ;;  %v631_v27 = vmul.f32 %v446_v46, %v256_v25  ;;  %v329_v43 = vadd.f32 %v1098_v49, %v328_v22 }
  0xa3   :  { %v641_v28 = vmul.f32 %v496_v8, %v281_v26  ;;  %671 = vst.msk [vmem:[%s1345_s4 + $0x18] sm:$0xff] %vm178_vm0, %v631_v27 }
  0xa5   :  { %681 = vst.msk [vmem:[%s1345_s4 + $0x68] sm:$0xff] %vm178_vm0, %v641_v28  ;;  %v305_v31 = vpop.f32.mrf.mxu2 }
  0xa6   :  { %v1151_v29 = vpop.permute.xlu2 %575  ;;  %v306_v34 = vadd.f32 %v1098_v49, %v305_v31  ;;  %v258_v36 = vpop.f32.mrf.mxu0 }
  0xa7   :  { %v1161_v30 = vpop.permute.xlu1 %525  ;;  %v1163_v33 = vpop.permute.xlu0 %520  ;;  %v259_v40 = vadd.f32 %v1098_v49, %v258_v36 }
  0xa8   :  { %v1166_v35 = vpop.f32.mrf.mxu3  ;;  %v283_v37 = vpop.f32.mrf.mxu1  ;;  %v651_v39 = vmul.f32 %v546_v7, %v306_v34 }
  0xa9   :  { %v284_v42 = vadd.f32 %v1098_v49, %v283_v37  ;;  %v632_v44 = vmul.f32 %v1076_v32, %v259_v40  ;;  %v326_v37 = vadd.f32 %v1098_v49, %v1133_v11 }
  0xaa   :  { %691 = vst.msk [vmem:[%s1345_s4 + $0xb8] sm:$0xff] %vm178_vm0, %v651_v39 }
  0xab   :  { %v642_v46 = vmul.f32 %v1091_v45, %v284_v42  ;;  %672 = vst.msk [vmem:[%s1345_s4 + $0x20] sm:$0xff] %vm178_vm0, %v632_v44 }
  0xad   :  { %682 = vst.msk [vmem:[%s1345_s4 + $0x70] sm:$0xff] %vm178_vm0, %v642_v46  ;;  %v308_v32 = vpop.f32.mrf.mxu2 }
  0xae   :  { %v591_v47 = vpop.permute.xlu2 %590  ;;  %v260_v59 = vpop.f32.mrf.mxu0  ;;  %v309_v3 = vadd.f32 %v1098_v49, %v308_v32  ;;  %v331_v32 = vadd.f32 %v1098_v49, %v1166_v35 }
  0xaf   :  { %v660_v53 = vmul.f32 %v591_v47, %v329_v43  ;;  %v541_v55 = vpop.permute.xlu1 %540  ;;  %v536_v56 = vpop.permute.xlu0 %535  ;;  %v261_v62 = vadd.f32 %v1098_v49, %v260_v59 }
  0xb0   :  { %v650_v45 = vmul.f32 %v541_v55, %v304_v52  ;;  %v1191_v57 = vpop.f32.mrf.mxu3  ;;  %v649_v58 = vmul.f32 %v536_v56, %v301_v54  ;;  %v285_v60 = vpop.f32.mrf.mxu1 }
  0xb1   :  { %700 = vst.msk [vmem:[%s1345_s4 + $0x100] sm:$0xff] %vm178_vm0, %v660_v53  ;;  %v286_v0 = vadd.f32 %v1098_v49, %v285_v60  ;;  %v633_v1 = vmul.f32 %v1084_v38, %v261_v62  ;;  %v334_v55 = vadd.f32 %v1098_v49, %v1191_v57 }
  0xb2   :  { %690 = vst.msk [vmem:[%s1345_s4 + $0xb0] sm:$0xff] %vm178_vm0, %v650_v45 }
  0xb3   :  { %689 = vst.msk [vmem:[%s1345_s4 + $0xa8] sm:$0xff] %vm178_vm0, %v649_v58  ;;  %v643_v2 = vmul.f32 %v506_v21, %v286_v0 }
  0xb4   :  { %673 = vst.msk [vmem:[%s1345_s4 + $0x28] sm:$0xff] %vm178_vm0, %v633_v1 }
  0xb5   :  { %683 = vst.msk [vmem:[%s1345_s4 + $0x78] sm:$0xff] %vm178_vm0, %v643_v2  ;;  %v310_v6 = vpop.f32.mrf.mxu2 }
  0xb6   :  { %v606_v4 = vpop.permute.xlu2 %605  ;;  %v311_v8 = vadd.f32 %v1098_v49, %v310_v6  ;;  %v263_v12 = vpop.f32.mrf.mxu0 }
  0xb7   :  { %v556_v5 = vpop.permute.xlu1 %555  ;;  %v551_v7 = vpop.permute.xlu0 %550  ;;  %v264_v15 = vadd.f32 %v1098_v49, %v263_v12 }
  0xb8   :  { %v335_v38 = vpop.f32.mrf.mxu3  ;;  %v652_v9 = vmul.f32 %v551_v7, %v309_v3  ;;  %v288_v13 = vpop.f32.mrf.mxu1  ;;  %v653_v14 = vmul.f32 %v556_v5, %v311_v8 }
  0xb9   :  { %v336_v10 = vadd.f32 %v1098_v49, %v335_v38  ;;  %v289_v16 = vadd.f32 %v1098_v49, %v288_v13  ;;  %v634_v20 = vmul.f32 %v1102_v51, %v264_v15 }
  0xba   :  { %692 = vst.msk [vmem:[%s1345_s4 + $0xc0] sm:$0xff] %vm178_vm0, %v652_v9 }
  0xbb   :  { %v663_v17 = vmul.f32 %v606_v4, %v336_v10  ;;  %693 = vst.msk [vmem:[%s1345_s4 + $0xc8] sm:$0xff] %vm178_vm0, %v653_v14  ;;  %v644_v21 = vmul.f32 %v1147_v19, %v289_v16 }
  0xbc   :  { %674 = vst.msk [vmem:[%s1345_s4 + $0x30] sm:$0xff] %vm178_vm0, %v634_v20 }
  0xbd   :  { %703 = vst.msk [vmem:[%s1345_s4 + $0x118] sm:$0xff] %vm178_vm0, %v663_v17  ;;  %v313_v23 = vpop.f32.mrf.mxu2 }
  0xbe   :  { %684 = vst.msk [vmem:[%s1345_s4 + $0x80] sm:$0xff] %vm178_vm0, %v644_v21  ;;  %v314_v19 = vadd.f32 %v1098_v49, %v313_v23  ;;  %v265_v25 = vpop.f32.mrf.mxu0  ;;  %v621_v1 = vpop.permute.xlu2 %620 }
  0xbf   :  { %v571_v22 = vpop.permute.xlu1 %570  ;;  %v566_v51 = vpop.permute.xlu0 %565  ;;  %v266_v28 = vadd.f32 %v1098_v49, %v265_v25 }
  0xc0   :  { %v338_v24 = vpop.f32.mrf.mxu3  ;;  %v290_v26 = vpop.f32.mrf.mxu1  ;;  %v654_v27 = vmul.f32 %v1137_v18, %v314_v19  ;;  %v324_v18 = vadd.f32 %v1098_v49, %v1113_v63 }
  0xc1   :  { %v291_v31 = vadd.f32 %v1098_v49, %v290_v26  ;;  %v635_v34 = vmul.f32 %v1100_v50, %v266_v28  ;;  %v339_v8 = vadd.f32 %v1098_v49, %v338_v24 }
  0xc2   :  { %694 = vst.msk [vmem:[%s1345_s4 + $0xd0] sm:$0xff] %vm178_vm0, %v654_v27 }
  0xc3   :  { %v645_v36 = vmul.f32 %v1093_v48, %v291_v31  ;;  %675 = vst.msk [vmem:[%s1345_s4 + $0x38] sm:$0xff] %vm178_vm0, %v635_v34 }
  0xc5   :  { %685 = vst.msk [vmem:[%s1345_s4 + $0x88] sm:$0xff] %vm178_vm0, %v645_v36  ;;  %v315_v50 = vpop.f32.mrf.mxu2 }
  0xc6   :  { %v316_v42 = vadd.f32 %v1098_v49, %v315_v50  ;;  %v268_v44 = vpop.f32.mrf.mxu0 }
  0xc7   :  { %v586_v39 = vpop.permute.xlu1 %585  ;;  %v581_v48 = vpop.permute.xlu0 %580  ;;  %v269_v47 = vadd.f32 %v1098_v49, %v268_v44 }
  0xc8   :  { %v659_v40 = vmul.f32 %v586_v39, %v326_v37  ;;  %v340_v11 = vpop.f32.mrf.mxu3  ;;  %v658_v43 = vmul.f32 %v581_v48, %v324_v18  ;;  %v293_v46 = vpop.f32.mrf.mxu1  ;;  %v655_v63 = vmul.f32 %v566_v51, %v316_v42 }
  0xc9   :  { %v294_v52 = vadd.f32 %v1098_v49, %v293_v46  ;;  %v636_v53 = vmul.f32 %v1089_v41, %v269_v47  ;;  %v341_v7 = vadd.f32 %v1098_v49, %v340_v11 }
  0xca   :  { %699 = vst.msk [vmem:[%s1345_s4 + $0xf8] sm:$0xff] %vm178_vm0, %v659_v40 }
  0xcb   :  { %698 = vst.msk [vmem:[%s1345_s4 + $0xf0] sm:$0xff] %vm178_vm0, %v658_v43  ;;  %v646_v54 = vmul.f32 %v1163_v33, %v294_v52 }
  0xcc   :  { %695 = vst.msk [vmem:[%s1345_s4 + $0xd8] sm:$0xff] %vm178_vm0, %v655_v63 }
  0xcd   :  { %676 = vst.msk [vmem:[%s1345_s4 + $0x40] sm:$0xff] %vm178_vm0, %v636_v53  ;;  %v318_v41 = vpop.f32.mrf.mxu2 }
  0xce   :  { %686 = vst.msk [vmem:[%s1345_s4 + $0x90] sm:$0xff] %vm178_vm0, %v646_v54  ;;  %v319_v58 = vadd.f32 %v1098_v49, %v318_v41  ;;  %v270_v62 = vpop.f32.mrf.mxu0 }
  0xcf   :  { %v601_v45 = vpop.permute.xlu1 %600  ;;  %v596_v33 = vpop.permute.xlu0 %595  ;;  %v271_v2 = vadd.f32 %v1098_v49, %v270_v62 }
  0xd0   :  { %v662_v56 = vmul.f32 %v601_v45, %v334_v55  ;;  %v343_v57 = vpop.f32.mrf.mxu3  ;;  %v661_v59 = vmul.f32 %v596_v33, %v331_v32  ;;  %v295_v0 = vpop.f32.mrf.mxu1  ;;  %v656_v35 = vmul.f32 %v571_v22, %v319_v58 }
  0xd1   :  { %v344_v60 = vadd.f32 %v1098_v49, %v343_v57  ;;  %v296_v3 = vadd.f32 %v1098_v49, %v295_v0  ;;  %v637_v5 = vmul.f32 %v1110_v61, %v271_v2 }
  0xd2   :  { %702 = vst.msk [vmem:[%s1345_s4 + $0x110] sm:$0xff] %vm178_vm0, %v662_v56 }
  0xd3   :  { %701 = vst.msk [vmem:[%s1345_s4 + $0x108] sm:$0xff] %vm178_vm0, %v661_v59  ;;  %v666_v4 = vmul.f32 %v621_v1, %v344_v60  ;;  %v647_v6 = vmul.f32 %v1161_v30, %v296_v3 }
  0xd4   :  { %696 = vst.msk [vmem:[%s1345_s4 + $0xe0] sm:$0xff] %vm178_vm0, %v656_v35 }
  0xd5   :  { %706 = vst.msk [vmem:[%s1345_s4 + $0x130] sm:$0xff] %vm178_vm0, %v666_v4  ;;  %v320_v30 = vpop.f32.mrf.mxu2 }
  0xd6   :  { %677 = vst.msk [vmem:[%s1345_s4 + $0x48] sm:$0xff] %vm178_vm0, %v637_v5  ;;  %v321_v10 = vadd.f32 %v1098_v49, %v320_v30 }
  0xd7   :  { %687 = vst.msk [vmem:[%s1345_s4 + $0x98] sm:$0xff] %vm178_vm0, %v647_v6  ;;  %v616_v61 = vpop.permute.xlu1 %615  ;;  %v611_v9 = vpop.permute.xlu0 %610 }
  0xd8   :  { %v665_v38 = vmul.f32 %v616_v61, %v341_v7  ;;  %v664_v12 = vmul.f32 %v611_v9, %v339_v8  ;;  %v657_v13 = vmul.f32 %v1151_v29, %v321_v10  ;;  %v345_v14 = vpop.f32.mrf.mxu3 }
  0xd9   :  { %v346_v15 = vadd.f32 %v1098_v49, %v345_v14 }
  0xda   :  { %705 = vst.msk [vmem:[%s1345_s4 + $0x128] sm:$0xff] %vm178_vm0, %v665_v38 }
  0xdb   :  { %704 = vst.msk [vmem:[%s1345_s4 + $0x120] sm:$0xff] %vm178_vm0, %v664_v12 }
  0xdc   :  { %697 = vst.msk [vmem:[%s1345_s4 + $0xe8] sm:$0xff] %vm178_vm0, %v657_v13 }
  0xdf   :  { %v626_v16 = vpop.permute.xlu0 %625 }
  0xe0   :  { %v667_v17 = vmul.f32 %v626_v16, %v346_v15 }
  0xe2   :  { %707 = vst.msk [vmem:[%s1345_s4 + $0x138] sm:$0xff] %vm178_vm0, %v667_v17 }

</bundles_post_ra>
